<compile_context>
chip_gen: v7x
topology: tpu7x:2x2x1
jax: 0.10.0
libtpu: 0.0.40
codegen_flags: <defaults>
</compile_context>

<pallas_src>
import functools
import random

import jax
import jax.numpy as jnp
from jax.experimental import pallas as pl
from jax.experimental.pallas import tpu as pltpu


_TARGET_BLOCK_BYTES = 4 * 1024 * 1024   # ~4 MiB per slab DMA
_VMEM_LIMIT_BYTES = 32 * 1024 * 1024    # safe on v5e/v6e (128 MiB) and v7x (64 MiB)


def _pick_block_rows(nc: int, plane_bytes: int) -> int:
    """Fused (N*C) planes per block: big slabs, but keep >= 2 grid steps."""
    rows = max(1, _TARGET_BLOCK_BYTES // max(plane_bytes, 1))
    rows = min(rows, nc)
    if nc >= 2:
        rows = min(rows, -(-nc // 2))  # ceil(nc/2): grid >= 2 (v7x has 2 TCs)
    return max(1, rows)


def _dynamic_roll_kernel(shift_ref, x_ref, o_ref):
    """Circularly shift a (rows, H, W) slab by runtime shifts held in SMEM."""
    v = x_ref[...]
    v = pltpu.roll(v, shift_ref[0], axis=1)   # H roll (sublane rotate, XLU)
    v = pltpu.roll(v, shift_ref[1], axis=2)   # W roll (lane rotate, XLU)
    o_ref[...] = v


@functools.lru_cache(maxsize=None)
def _build_dynamic_jitter(nc: int, h: int, w: int, dtype_name: str, block_rows: int):
    dtype = jnp.dtype(dtype_name)
    grid = (pl.cdiv(nc, block_rows),)
    nbytes = nc * h * w * dtype.itemsize
    return pl.pallas_call(
        _dynamic_roll_kernel,
        out_shape=jax.ShapeDtypeStruct((nc, h, w), dtype),
        grid_spec=pltpu.PrefetchScalarGridSpec(
            num_scalar_prefetch=1,
            grid=grid,
            in_specs=[pl.BlockSpec((block_rows, h, w), lambda i, s: (i, 0, 0))],
            out_specs=pl.BlockSpec((block_rows, h, w), lambda i, s: (i, 0, 0)),
        ),
        compiler_params=pltpu.CompilerParams(
            dimension_semantics=("parallel",),
            vmem_limit_bytes=_VMEM_LIMIT_BYTES,
        ),
        cost_estimate=pl.CostEstimate(
            flops=0, transcendentals=0, bytes_accessed=2 * nbytes),
    )


@functools.lru_cache(maxsize=None)
def _roll_sign(h: int, w: int, dtype_name: str):
    """One-time probe of pltpu.roll's dynamic-shift rotate per (H, W, dtype).

    Returns (sign_h, sign_w) such that
        pltpu.roll(x, s, axis) == jnp.roll(x, sign * s, axis)
    or None if the dynamic path does not lower / behave, in which case the
    static-shift fallback kernel is used instead.
    """
    dtype = jnp.dtype(dtype_name)
    sh = 1 if h > 1 else 0
    sw = 1 if w > 1 else 0
    nc = 4
    x = jnp.arange(nc * h * w, dtype=jnp.float32).reshape(nc, h, w).astype(dtype)
    try:
        fn = _build_dynamic_jitter(
            nc, h, w, dtype_name, _pick_block_rows(nc, h * w * dtype.itemsize))
        y = fn(jnp.array([sh, sw], dtype=jnp.int32), x)
        y = jax.block_until_ready(y)
    except Exception:
        return None
    for sign_h in (1, -1):
        for sign_w in (1, -1):
            ref = jnp.roll(x, (sign_h * sh, sign_w * sw), axis=(1, 2))
            if bool(jnp.array_equal(y, ref)):
                return (sign_h, sign_w)
    return None


# --------------------------- static-shift fallback ---------------------------
# Previously validated kernel (offsets baked in at trace time).  Only used if
# the dynamic-shift rotate is unavailable on the current backend; it recompiles
# per distinct offset pair, so the dynamic path above is strongly preferred.

@functools.lru_cache(maxsize=256)
def _build_static_jitter(n, c, h, w, dtype_name, off_h, off_w):
    dtype = jnp.dtype(dtype_name)

    def kernel(x_ref, o_ref):
        o_ref[...] = jnp.roll(x_ref[...], shift=(off_h, off_w), axis=(0, 1))

    return pl.pallas_call(
        kernel,
        out_shape=jax.ShapeDtypeStruct((n, c, h, w), dtype),
        grid=(n, c),
        in_specs=[pl.BlockSpec((None, None, h, w), lambda i, j: (i, j, 0, 0))],
        out_specs=pl.BlockSpec((None, None, h, w), lambda i, j: (i, j, 0, 0)),
        compiler_params=pltpu.CompilerParams(
            dimension_semantics=("parallel", "parallel")),
    )


# -------------------------------- public API ---------------------------------

def jitter(x: jax.Array, off_h: int, off_w: int) -> jax.Array:
    """Equivalent of torch.roll(x, shifts=(off_h, off_w), dims=(2, 3)) (NCHW)."""
    n, c, h, w = x.shape
    nc = n * c
    off_h = int(off_h) % h
    off_w = int(off_w) % w

    signs = _roll_sign(h, w, str(x.dtype))
    if signs is None:
        # TODO(synk): dynamic (runtime-shift) rotate not available on this
        # backend; fall back to the static-shift kernel (recompiles per offset).
        return _build_static_jitter(n, c, h, w, str(x.dtype), off_h, off_w)(x)

    sign_h, sign_w = signs
    k_h = off_h if sign_h == 1 else (h - off_h) % h
    k_w = off_w if sign_w == 1 else (w - off_w) % w

    block_rows = _pick_block_rows(nc, h * w * x.dtype.itemsize)
    fn = _build_dynamic_jitter(nc, h, w, str(x.dtype), block_rows)
    shifts = jnp.array([k_h, k_w], dtype=jnp.int32)
    y = fn(shifts, x.reshape(nc, h, w))
    return y.reshape(n, c, h, w)


class Jitter:
    """JAX/Pallas port of augmentation.pre.Jitter."""

    def __init__(self, lim: int = 32):
        self.lim = lim

    def __call__(self, x: jax.Array) -> jax.Array:
        # Offsets come from Python's RNG exactly like the PyTorch module.
        off1 = random.randint(-self.lim, self.lim)
        off2 = random.randint(-self.lim, self.lim)
        return jitter(x, off1, off2)


if __name__ == "__main__":
    random.seed(0)
    key = jax.random.PRNGKey(0)

    N, C, H, W = 2, 4, 16, 16
    x = jax.random.normal(key, (N, C, H, W), dtype=jnp.float32)

    module = Jitter(lim=32)

    # Check several random offset draws (including negatives) against jnp.roll.
    # The dynamic kernel compiles once; offsets are runtime scalars.
    for _ in range(4):
        state = random.getstate()
        off1 = random.randint(-module.lim, module.lim)
        off2 = random.randint(-module.lim, module.lim)
        random.setstate(state)

        y = module(x)
        y = jax.block_until_ready(y)

        ref = jnp.roll(x, shift=(off1, off2), axis=(2, 3))
        assert y.shape == x.shape and y.dtype == x.dtype
        assert bool(jnp.array_equal(y, ref)), (
            f"Pallas jitter mismatch for offsets {(off1, off2)}")

    print("KERNEL_OK")
</pallas_src>

<mosaic_0001>
module attributes {stable_mosaic.version = 11 : i64} {
  func.func @_dynamic_roll_kernel(%arg0: i32, %arg1: memref<2xi32, #tpu.memory_space<smem>>, %arg2: memref<2x16x16xf32, #tpu.memory_space<vmem>>, %arg3: memref<2x16x16xf32, #tpu.memory_space<vmem>>) attributes {dimension_semantics = [#tpu.dimension_semantics<parallel>], iteration_bounds = array<i64: 2>, scalar_prefetch = 1 : i64, scratch_operands = 0 : i64, tpu.core_type = #tpu.core_type<tc>, window_params = [{transform_indices = @transform_0, window_bounds = array<i64: 2, 16, 16>}, {transform_indices = @transform_1, window_bounds = array<i64: 2, 16, 16>}]} {
    %c0 = arith.constant 0 : index
    %c0_0 = arith.constant 0 : index
    %c0_1 = arith.constant 0 : index
    %0 = vector.load %arg2[%c0, %c0_0, %c0_1] : memref<2x16x16xf32, #tpu.memory_space<vmem>>, vector<2x16x16xf32>
    %c0_2 = arith.constant 0 : index
    %1 = memref.load %arg1[%c0_2] : memref<2xi32, #tpu.memory_space<smem>>
    %2 = tpu.dynamic_rotate %0 by %1 dim 1 : vector<2x16x16xf32>, i32 -> vector<2x16x16xf32>
    %c1 = arith.constant 1 : index
    %3 = memref.load %arg1[%c1] : memref<2xi32, #tpu.memory_space<smem>>
    %4 = tpu.dynamic_rotate %2 by %3 dim 2 : vector<2x16x16xf32>, i32 -> vector<2x16x16xf32>
    %c0_3 = arith.constant 0 : index
    %c0_4 = arith.constant 0 : index
    %c0_5 = arith.constant 0 : index
    %5 = vector.load %arg3[%c0_3, %c0_4, %c0_5] : memref<2x16x16xf32, #tpu.memory_space<vmem>>, vector<2x16x16xf32>
    tpu.vector_store %arg3[%c0_3, %c0_4, %c0_5], %4 {strides = array<i32>} : memref<2x16x16xf32, #tpu.memory_space<vmem>>, vector<2x16x16xf32>,
    return
  }
  func.func @transform_0(%arg0: i32, %arg1: memref<2xi32, #tpu.memory_space<smem>>) -> (i32, i32, i32) {
    %c0_i32 = arith.constant 0 : i32
    %c0_i32_0 = arith.constant 0 : i32
    %c0_i32_1 = arith.constant 0 : i32
    return %arg0, %c0_i32, %c0_i32_0 : i32, i32, i32
  }
  func.func @transform_1(%arg0: i32, %arg1: memref<2xi32, #tpu.memory_space<smem>>) -> (i32, i32, i32) {
    %c0_i32 = arith.constant 0 : i32
    %c0_i32_0 = arith.constant 0 : i32
    %c0_i32_1 = arith.constant 0 : i32
    return %arg0, %c0_i32, %c0_i32_0 : i32, i32, i32
  }
}

module attributes {stable_mosaic.version = 11 : i64} {
  func.func @kernel(%arg0: i32, %arg1: i32, %arg2: memref<1x1x16x16xf32, #tpu.memory_space<vmem>>, %arg3: memref<1x1x16x16xf32, #tpu.memory_space<vmem>>) attributes {dimension_semantics = [#tpu.dimension_semantics<parallel>, #tpu.dimension_semantics<parallel>], iteration_bounds = array<i64: 2, 4>, scalar_prefetch = 0 : i64, scratch_operands = 0 : i64, tpu.core_type = #tpu.core_type<tc>, window_params = [{transform_indices = @transform_0, window_bounds = array<i64: 1, 1, 16, 16>}, {transform_indices = @transform_1, window_bounds = array<i64: 1, 1, 16, 16>}]} {
    %c0 = arith.constant 0 : index
    %c0_0 = arith.constant 0 : index
    %c0_1 = arith.constant 0 : index
    %c0_2 = arith.constant 0 : index
    %0 = vector.load %arg2[%c0, %c0_0, %c0_1, %c0_2] : memref<1x1x16x16xf32, #tpu.memory_space<vmem>>, vector<1x1x16x16xf32>
    %1 = vector.shape_cast %0 : vector<1x1x16x16xf32> to vector<16x16xf32>
    %2 = vector.extract_strided_slice %1 {offsets = [15, 0], sizes = [1, 16], strides = [1, 1]} : vector<16x16xf32> to vector<1x16xf32>
    %3 = vector.extract_strided_slice %1 {offsets = [0, 0], sizes = [15, 16], strides = [1, 1]} : vector<16x16xf32> to vector<15x16xf32>
    %4 = tpu.concatenate %2, %3 in 0 : vector<1x16xf32>, vector<15x16xf32> -> vector<16x16xf32>
    %5 = vector.extract_strided_slice %4 {offsets = [0, 11], sizes = [16, 5], strides = [1, 1]} : vector<16x16xf32> to vector<16x5xf32>
    %6 = vector.extract_strided_slice %4 {offsets = [0, 0], sizes = [16, 11], strides = [1, 1]} : vector<16x16xf32> to vector<16x11xf32>
    %7 = tpu.concatenate %5, %6 in 1 : vector<16x5xf32>, vector<16x11xf32> -> vector<16x16xf32>
    %c0_3 = arith.constant 0 : index
    %c0_4 = arith.constant 0 : index
    %c0_5 = arith.constant 0 : index
    %c0_6 = arith.constant 0 : index
    %8 = vector.load %arg3[%c0_3, %c0_4, %c0_5, %c0_6] : memref<1x1x16x16xf32, #tpu.memory_space<vmem>>, vector<1x1x16x16xf32>
    %9 = vector.shape_cast %8 : vector<1x1x16x16xf32> to vector<16x16xf32>
    %10 = vector.shape_cast %7 : vector<16x16xf32> to vector<1x1x16x16xf32>
    tpu.vector_store %arg3[%c0_3, %c0_4, %c0_5, %c0_6], %10 {strides = array<i32>} : memref<1x1x16x16xf32, #tpu.memory_space<vmem>>, vector<1x1x16x16xf32>,
    return
  }
  func.func @transform_0(%arg0: i32, %arg1: i32) -> (i32, i32, i32, i32) {
    %c0_i32 = arith.constant 0 : i32
    %c0_i32_0 = arith.constant 0 : i32
    %c0_i32_1 = arith.constant 0 : i32
    return %arg0, %arg1, %c0_i32, %c0_i32_0 : i32, i32, i32, i32
  }
  func.func @transform_1(%arg0: i32, %arg1: i32) -> (i32, i32, i32, i32) {
    %c0_i32 = arith.constant 0 : i32
    %c0_i32_0 = arith.constant 0 : i32
    %c0_i32_1 = arith.constant 0 : i32
    return %arg0, %arg1, %c0_i32, %c0_i32_0 : i32, i32, i32, i32
  }
}

</mosaic_0001>

<bundles_post_ra>
// kernel: tpu_custom_call.1
= control target key start
LH: loop header
LB: loop body
LE: loop exit
PB: predicated region body
PF: predicated region fallthrough
CT: control target
= control target key end

     0   :  { %6 = vsyncpa [#allocation3], 0  ;;  %s733_s0 = inlined_call_operand.hbm [shape: f32[2,4,16,16], index: 0, kind: input, shape index: {}]   ;;  %s734_s1 = inlined_call_operand.hbm [shape: f32[2,4,16,16], index: 1, kind: output, shape index: {}]  }
   0x1   :  { %8 = vsyncpa [#allocation3 + $0x1], 0 }
   0x2   :  { %9 = vsyncpa [#allocation4], 0 }
   0x3   :  { %11 = vsyncpa [#allocation4 + $0x1], 0  ;;  %s538_s6 = smov 0   ;;  %s540_s7 = smov 0  }
   0x4   :  { %s542_s8 = smov 0   ;;  %s544_s9 = smov 0  }
   0x5   :  { %s546_s10 = smov 0   ;;  %s548_s11 = smov 0  }
   0x6   :  { %s550_s12 = smov 0   ;;  %s552_s13 = smov 0  }
   0x7 LB: > { %s289_s14 = sadd.s32 4294967295, %s518_s13   ;;  %s290_s15 = sadd.s32 4294967294, %s518_s13   ;;  %s518_s13 = sphi %s552_s13, %s17_s13   ;;  %s514_s12 = sphi %s550_s12, %s749_s12   ;;  %s510_s11 = sphi %s548_s11, %s748_s11   ;;  %s506_s10 = sphi %s546_s10, %s747_s10   ;;  %s502_s9 = sphi %s544_s9, %s746_s9   ;;  %s498_s8 = sphi %s542_s8, %s745_s8   ;;  %s494_s7 = sphi %s540_s7, %s744_s7   ;;  %s490_s6 = sphi %s538_s6, %s743_s6  }
   0x8   : > { %s26_s16 = sadd.s32 1, %s510_s11  ;;  %s29_s17 = sadd.s32 1, %s514_s12 }
   0x9   : > { %p27_p0 = scmp.ge.s32.totalorder %s26_s16, 4  ;;  %s38_s18 = sadd.s32 1, %s498_s8 }
   0xa   : > { %p45_p1 = scmp.ne.s32.totalorder %s498_s8, %s494_s7  ;;  %p46_p2 = scmp.eq.s32.totalorder %s518_s13, 0 }
   0xb   : > { %s751_s16 = smov (%p27_p0, %s26_s16), 0  ;;  %s753_s17 = smov (!%p27_p0, %s29_s17), %s514_s12 }
   0xc   : > { %s34_s19 = ssub.s32 %s510_s11, %s751_s16  ;;  %p591_p3 = por %p46_p2, %p45_p1 }
   0xd   : > { %p31_p4 = scmp.ge.s32.totalorder %s753_s17, 2  ;;  %p51_p5 = scmp.ne.s32.totalorder %s494_s7, %s490_s6 }
   0xe   : > { %p52_p6 = scmp.eq.s32.totalorder %s289_s14, 0  ;;  %p77_p7 = scmp.eq.s32.totalorder %s289_s14, 7 }
   0xf   : > { %s755_s17 = smov (%p31_p4, %s753_s17), 0  ;;  %p83_p10 = scmp.eq.s32.totalorder %s290_s15, 7 }
  0x10   : > { %p599_p8 = por %p52_p6, %p51_p5  ;;  %p603_p9 = por %p77_p7, %p45_p1 }
  0x11   : > { %s33_s23 = ssub.s32 %s514_s12, %s755_s17  ;;  %p609_p12 = por %p83_p10, %p51_p5 }
  0x12   : > { %s738_s22 = scalar_select %p603_p9, 1, 0 }
  0x13   : > { %s35_s24 = sor.u32 %s34_s19, %s33_s23  ;;  %p318_p13 = scmp.lt.s32.totalorder %s518_s13, 8 }
  0x14   : > { %p36_p11 = scmp.eq.s32.totalorder %s35_s24, 0  ;;  %s103_s26 = sand.u32 1, %s498_s8  }
  0x15   : > { %s739_s25 = scalar_select %p609_p12, 1, 0 }
  0x16   : > { %s616_s27 = scalar_select %p36_p11, %s498_s8, %s38_s18  }
  0x17   : > { %s293_s28 = sshll.u32 %s103_s26, 4  ;;  %s294_s29 = sshll.u32 %s510_s11, 1 }
  0x18   : > { %s295_s30 = sshll.u32 %s514_s12, 3  ;;  %s107_s2 = scalar_lea.vmem [#allocation2], %s293_s28 }
  0x19   : > { %s116_s3 = sshll.u32 %s107_s2, 4  ;;  %s113_s4 = sadd.s32 %s295_s30, %s294_s29  ;;  %s620_s3 = int_to_ptr.vmem [resolvable:$true] %s116_s3 }
  0x1a   : > { %s296_s5 = sshll.u32 %s113_s4, 7  ;;  %p624_p0 = pnand %p318_p13, %p591_p3 }
  0x1b   : > { %s631_s18 = scalar_lea.hbm %s733_s0, %s296_s5  ;;  %s633_s23 = scalar_lea.sflag [#allocation3], %s103_s26 }
  0x1c   : > { %s390_s24 = scalar_lea.hbm %s631_s18, 256  ;;  %p392_p2 = pneg %p624_p0 }
  0x1d   : > { %p391_p1 = scmp.ne.s32.totalorder %s631_s18, %s390_s24  ;;  %s395_s29 = scalar_lea.hbm %s733_s0, 2048 }
  0x1e   : > { %p396_p5 = scmp.lt.u32.totalorder %s631_s18, %s733_s0  ;;  %p397_p6 = scmp.lt.u32.totalorder %s395_s29, %s390_s24 }
  0x1f   : > { %p393_p3 = pnand %p392_p2, %p391_p1  ;;  %p399_p10 = scmp.lt.u32.totalorder %s390_s24, %s631_s18 }
  0x20   : > { %p398_p7 = por %p397_p6, %p396_p5 }
  0x21   : > { %p394_p4 = pneg %p393_p3 }
  0x22   : > { %p400_p11 = por %p399_p10, %p398_p7 }
  0x24   : > { %p401_p13 = pnand %p400_p11, %p394_p4 }
  0x26   : > { %404 = shalt.err (!%p401_p13)
}
  0x27   : > { %s405_s26 = scalar_lea.vmem %s620_s3, 256  ;;  %s520_s4 = smov [#allocation2]  }
  0x28   : > { %p406_p1 = scmp.ne.s32.totalorder %s620_s3, %s405_s26  ;;  %s410_s5 = sshll.u32 %s520_s4, 4  ;;  %s411_s5 = int_to_ptr.vmem [resolvable:$false] %s410_s5 }
  0x29   : > { %s412_s15 = scalar_lea.vmem %s411_s5, 512  ;;  %p413_p9 = scmp.lt.s32.totalorder %s620_s3, %s411_s5 }
  0x2a   : > { %p408_p3 = pnand %p406_p1, %p392_p2  ;;  %p414_p5 = scmp.lt.s32.totalorder %s412_s15, %s405_s26 }
  0x2c   : > { %p409_p12 = pneg %p408_p3  ;;  %p415_p6 = por %p414_p5, %p413_p9 }
  0x2e   : > { %p416_p7 = pnand %p415_p6, %p409_p12 }
  0x30   : > { %419 = shalt.err (!%p416_p7)
}
  0x31   : > { %s521_s19 = smov 128   ;;  %s522_s24 = smov 8  }
  0x32   : > { %313 = dma.hbm_to_vmem [thread:$0]  (!%p624_p0), %s631_s18, 256, %s620_s3, %s633_s23, %s521_s19, %s521_s19, %s522_s24  }
  0x33   : > { %p297_p2 = scmp.ge.s32.totalorder %s518_s13, 1  ;;  %p124_p4 = scmp.lt.s32.totalorder %s518_s13, 9 }
  0x35   : > { %p125_p10 = pnand %p297_p2, %p124_p4 }
  0x36   : > { %s664_s20 = sand.u32 (!%p125_p10), 1, %s494_s7  }
  0x37   : > { %128 = sbr.rel (%p125_p10) target bundleno = 202 (0xca), region = 24  ;;  %s298_s28 = sshll.u32 (!%p125_p10), %s664_s20, 4 }
  0x38   : > { %s131_s29 = scalar_lea.sflag (!%p125_p10), [#allocation3], %s664_s20  ;;  %s134_s30 = scalar_lea.vmem (!%p125_p10), [#allocation2], %s298_s28 }
  0x3e   : > { %481 = dma.done.wait (%p599_p8), %s131_s29, 256  }
  0x3f   : > { %483 = vsyncadd (%p599_p8), %s131_s29, 4294967040  ;;  %v153_v0 = vld [vmem:[%s134_s30] sm:$0xff]  ;;  %v154_v1 = vld [vmem:[%s134_s30 + $0x8] sm:$0xff]  ;;  %vm159_vm0 = vcmask 1040384   ;;  %s523_s3 = smov 5   ;;  %s524_s14 = smov 117  }
  0x40   : > { %v156_v2 = vrot.slane %v154_v1, 7  ;;  %v160_v3 = vrot.slane %v153_v0, 7  ;;  %s301_s18 = sshll.u32 %s502_s9, 1  ;;  %s302_s23 = sshll.u32 %s506_s10, 3  ;;  %vm177_vm1 = vcmask 39936   ;;  %vm180_vm2 = vcmask 130048  }
  0x41   : > { %s196_s21 = sadd.s32 %s302_s23, %s301_s18  ;;  %s152_s2 = scalar_lea.vmem [#allocation5], %s298_s28 }
  0x42   : > { %v163_v4 = vsel %vm159_vm0, %v156_v2, %v160_v3  ;;  %v161_v5 = vsel %vm159_vm0, %v160_v3, %v156_v2  ;;  %s199_s26 = sshll.u32 %s152_s2, 4  ;;  %s303_s4 = sshll.u32 %s196_s21, 7  ;;  %s674_s26 = int_to_ptr.vmem [resolvable:$true] %s199_s26 }
  0x43   : > { %171 = vrot.lane.b32.xlu1 %v163_v4, %s523_s3  ;;  %165 = vrot.lane.b32.xlu0 %v163_v4, %s524_s14  ;;  %s679_s5 = scalar_lea.hbm %s734_s1, %s303_s4  ;;  %s184_s15 = scalar_lea.sflag [#allocation4], %s664_s20 }
  0x44   : > { %s420_s19 = scalar_lea.vmem %s674_s26, 256  ;;  %p741_p9 = scmp.ne.s32.totalorder %s738_s22, 0 }
  0x45   : > { %p421_p8 = scmp.ne.s32.totalorder %s674_s26, %s420_s19  ;;  %s525_s24 = smov [#allocation5]  }
  0x46   : > { %s424_s28 = sshll.u32 %s525_s24, 4  ;;  %s425_s28 = int_to_ptr.vmem [resolvable:$false] %s424_s28 }
  0x47   : > { %173 = vrot.lane.b32.xlu1 %v161_v5, %s523_s3  ;;  %167 = vrot.lane.b32.xlu0 %v161_v5, %s524_s14  ;;  %p422_p12 = pnand %p421_p8, %p741_p9  ;;  %s426_s29 = scalar_lea.vmem %s425_s28, 512 }
  0x48   : > { %p427_p11 = scmp.lt.s32.totalorder %s674_s26, %s425_s28  ;;  %p428_p13 = scmp.lt.s32.totalorder %s426_s29, %s420_s19 }
  0x49   : > { %p423_p0 = pneg %p422_p12 }
  0x4a   : > { %p429_p1 = por %p428_p13, %p427_p11 }
  0x4c   : > { %p430_p3 = pnand %p429_p1, %p423_p0 }
  0xb5   : > { %v172_v6 = vpop.permute.xlu1 %171  ;;  %v166_v7 = vpop.permute.xlu0 %165 }
  0xb6   : > { %v178_v8 = vsel %vm177_vm1, %v166_v7, %v172_v6 }
  0xb7   : > { %181 = vst.msk [vmem:[%s152_s2] sm:$0xff] %vm180_vm2, %v178_v8 }
  0xb9   : > { %v174_v9 = vpop.permute.xlu1 %173  ;;  %v168_v10 = vpop.permute.xlu0 %167 }
  0xba   : > { %v179_v11 = vsel %vm177_vm1, %v168_v10, %v174_v9 }
  0xbb   : > { %182 = vst.msk [vmem:[%s152_s2 + $0x8] sm:$0xff] %vm180_vm2, %v179_v11 }
  0xbc   : > { %433 = shalt.err (!%p430_p3)
}
  0xbd   : > { %s434_s30 = scalar_lea.hbm %s679_s5, 256  ;;  %s438_s18 = scalar_lea.hbm %s734_s1, 2048 }
  0xbe   : > { %p435_p5 = scmp.ne.s32.totalorder %s679_s5, %s434_s30  ;;  %p439_p2 = scmp.lt.u32.totalorder %s679_s5, %s734_s1 }
  0xbf   : > { %p440_p4 = scmp.lt.u32.totalorder %s438_s18, %s434_s30  ;;  %p442_p8 = scmp.lt.u32.totalorder %s434_s30, %s679_s5 }
  0xc0   : > { %p436_p6 = pnand %p435_p5, %p741_p9 }
  0xc1   : > { %p441_p10 = por %p440_p4, %p439_p2 }
  0xc2   : > { %p437_p7 = pneg %p436_p6 }
  0xc3   : > { %p443_p12 = por %p442_p8, %p441_p10 }
  0xc5   : > { %p444_p0 = pnand %p443_p12, %p437_p7 }
  0xc7   : > { %447 = shalt.err (!%p444_p0)
}
  0xc8   : > { %s526_s2 = smov 128   ;;  %s527_s4 = smov 8  }
  0xc9   : > { %308 = dma.vmem_to_hbm [thread:$0]  (%p741_p9), %s674_s26, 256, %s679_s5, %s184_s15, %s526_s2, %s526_s2, %s527_s4  }
  0xca PF: > { %p319_p11 = scmp.ge.s32.totalorder %s518_s13, 2  ;;  %s214_s9 = sand.u32 1, %s490_s6  }
  0xcb   : > { %p742_p13 = scmp.ne.s32.totalorder %s739_s25, 0  ;;  %s215_s10 = scalar_lea.sflag [#allocation4], %s214_s9 }
  0xcd   : > { %p315_p1 = pnand %p319_p11, %p742_p13 }
  0xcf   : > { %485 = dma.done.wait (!%p315_p1), %s215_s10, 256  }
  0xd0   : > { %487 = vsyncadd (!%p315_p1), %s215_s10, 4294967040  ;;  %s17_s13 = sadd.s32 1, %s518_s13   ;;  %s743_s6 = smov %s494_s7 }
  0xd1   : > { %p14_p3 = scmp.ge.s32.totalorder %s17_s13, 10   ;;  %s744_s7 = smov %s498_s8 }
  0xd2   : > { %s745_s8 = smov %s616_s27  ;;  %s746_s9 = smov %s510_s11 }
  0xd3   : > { %s747_s10 = smov %s514_s12  ;;  %s748_s11 = smov %s751_s16 }
  0xd4   : > { %s749_s12 = smov %s755_s17  ;;  %16 = sbr.rel (!%p14_p3) target bundleno = 7 (0x7), region = 69 }
  0xdb   :  { %220 = vsyncpa [#allocation3], 1 }
  0xdc   :  { %222 = vsyncpa [#allocation3 + $0x1], 1 }
  0xdd   :  { %223 = vsyncpa [#allocation4], 1 }
  0xde   :  { %225 = vsyncpa [#allocation4 + $0x1], 1 }

</bundles_post_ra>
